<compile_context>
chip_gen: v6e
topology: v6e:2x2x1
jax: 0.10.0
libtpu: 0.0.40
codegen_flags: <defaults>
</compile_context>

<pallas_src>
import functools

import jax
import jax.numpy as jnp
from jax.experimental import pallas as pl
from jax.experimental.pallas import tpu as pltpu


def interpolation_kernel(x_ref, w1_ref, b1_ref, w2_ref, b2_ref, o_ref):
    # One (bm, Dp) batch tile per grid step; both matmuls + sin fused.
    x = x_ref[...]                                                    # (bm, Dp)
    h = jnp.dot(x, w1_ref[...], preferred_element_type=jnp.float32)   # (bm, Hp) on MXU
    # NOTE(v7x): jnp.sin lowers to a VPU range-reduction polynomial (not a
    # single EUP op).  On v5e/v6e it hides under the HBM DMA; if profiling on
    # v7x (3.2 TB/s) shows the kernel flipping to VALU-bound, compute this in
    # bf16 or a bounded-range polynomial instead.
    h = jnp.sin(h + b1_ref[...])                                      # bias bcast (1, Hp)
    y = jnp.dot(h, w2_ref[...], preferred_element_type=jnp.float32)   # (bm, Dp) on MXU
    o_ref[...] = (y + b2_ref[...]).astype(o_ref.dtype)                # lane-dense store


def pack_interpolation_params(w1_t, b1, w2_t, b2, *, lane_width=128):
    """Pre-packs fc1/fc2 into the lane-dense block-diagonal form.

    Call ONCE (at model init).  The kron/tile ops and their HBM writes are not
    re-run per forward call.

    w1_t: (D, H)  fc1 weight, pre-transposed (in_features, out_features)
    b1:   (H,) or (1, H)
    w2_t: (H, D)  fc2 weight, pre-transposed
    b2:   (D,) or (1, D)
    """
    D, H = w1_t.shape
    b1 = jnp.asarray(b1).reshape(1, H)
    b2 = jnp.asarray(b2).reshape(1, D)
    pack = lane_width // D if (D < lane_width and lane_width % D == 0) else 1
    if pack > 1:
        eye = jnp.eye(pack, dtype=w1_t.dtype)
        w1p = jnp.kron(eye, w1_t)          # block-diag (D*pack, H*pack) == (128, pack*H)
        w2p = jnp.kron(eye, w2_t)          # block-diag (H*pack, D*pack) == (pack*H, 128)
        b1p = jnp.tile(b1, (1, pack))      # (1, H*pack)
        b2p = jnp.tile(b2, (1, pack))      # (1, D*pack)
    else:
        w1p, b1p, w2p, b2p = w1_t, b1, w2_t, b2   # fixed: correct assignment order
    return {"w1": w1p, "b1": b1p, "w2": w2p, "b2": b2p,
            "pack": pack, "input_dim": D, "hidden_dim": H}


def interpolation_layer(x, params, *, block_rows=2048):
    """Forward of InterpolationLayer.

    x: (B, D) float32; params from pack_interpolation_params().
    block_rows: max tile size in *packed* rows (each packed row = `pack` rows).
    """
    B, D = x.shape
    assert D == params["input_dim"]
    pack = params["pack"]
    Dp = D * pack
    Hp = params["hidden_dim"] * pack
    w1p, b1p, w2p, b2p = params["w1"], params["b1"], params["w2"], params["b2"]

    # ---- fold `pack` batch rows into one 128-wide lane-dense row ---------------
    tail = B % pack
    if tail:                                   # ragged case: pad only <pack tail rows
        xi = jnp.pad(x, ((0, pack - tail), (0, 0)))
    else:                                      # aligned case: pure bitcast reshape, no copy
        xi = x
    rows = xi.shape[0] // pack
    xp = xi.reshape(rows, Dp)

    # ---- batch tiling (packed-row units) ---------------------------------------
    # Aim for >= ~8 grid steps so the 'parallel' axis feeds both v7x TensorCores,
    # capped at block_rows (~1 MiB f32 x-tile) to sit near the HBM roofline.
    # TODO(synk): for v5e, add pipeline_mode=pl.Buffered(3) on the x spec if
    # profiling shows exposed per-tile DMA.
    target = -(-rows // 8)
    bm = max(8, min(block_rows, ((target + 7) // 8) * 8))
    grid = (pl.cdiv(rows, bm),)                # last block may overhang; Pallas masks it

    itemsize = jnp.dtype(x.dtype).itemsize
    cost = pl.CostEstimate(
        flops=4 * rows * Dp * Hp,              # two (block-diag) MXU matmuls
        transcendentals=rows * Hp,             # sin
        bytes_accessed=2 * rows * Dp * itemsize
        + (Dp * Hp + Hp * Dp + Hp + Dp) * itemsize,
    )

    out = pl.pallas_call(
        interpolation_kernel,
        out_shape=jax.ShapeDtypeStruct((rows, Dp), x.dtype),
        grid_spec=pltpu.PrefetchScalarGridSpec(
            num_scalar_prefetch=0,
            grid=grid,
            in_specs=[
                pl.BlockSpec((bm, Dp), lambda i: (i, 0)),   # x tile (lane-dense)
                pl.BlockSpec((Dp, Hp), lambda i: (0, 0)),   # fc1 weight (VMEM-resident)
                pl.BlockSpec((1, Hp), lambda i: (0, 0)),    # fc1 bias   (VMEM-resident)
                pl.BlockSpec((Hp, Dp), lambda i: (0, 0)),   # fc2 weight (VMEM-resident)
                pl.BlockSpec((1, Dp), lambda i: (0, 0)),    # fc2 bias   (VMEM-resident)
            ],
            out_specs=pl.BlockSpec((bm, Dp), lambda i: (i, 0)),
        ),
        compiler_params=pltpu.CompilerParams(
            dimension_semantics=("parallel",)),
        cost_estimate=cost,
    )(xp, w1p, b1p, w2p, b2p)

    y = out.reshape(rows * pack, D)
    return y if tail == 0 else y[:B]           # slice only on the ragged path


def init_params(key, input_dim, hidden_dim):
    """Mimics PyTorch nn.Linear default init U(-1/sqrt(fan_in), 1/sqrt(fan_in))."""
    k1, k2, k3, k4 = jax.random.split(key, 4)
    bound1 = 1.0 / jnp.sqrt(input_dim)
    bound2 = 1.0 / jnp.sqrt(hidden_dim)
    # Stored pre-transposed: (in_features, out_features).
    w1_t = jax.random.uniform(k1, (input_dim, hidden_dim), jnp.float32, -bound1, bound1)
    b1 = jax.random.uniform(k2, (1, hidden_dim), jnp.float32, -bound1, bound1)
    w2_t = jax.random.uniform(k3, (hidden_dim, input_dim), jnp.float32, -bound2, bound2)
    b2 = jax.random.uniform(k4, (1, input_dim), jnp.float32, -bound2, bound2)
    return w1_t, b1, w2_t, b2


if __name__ == "__main__":
    input_dim, hidden_dim = 32, 16

    key = jax.random.PRNGKey(0)
    kx, kp = jax.random.split(key)
    w1_t, b1, w2_t, b2 = init_params(kp, input_dim, hidden_dim)

    # Weight packing happens once, outside the per-call forward.
    params = pack_interpolation_params(w1_t, b1, w2_t, b2)
    fwd = jax.jit(lambda xx: interpolation_layer(xx, params))

    ok = True
    # Aligned batch, ragged-in-pack batch, and a multi-tile ragged batch
    # (exercises the cdiv-grid overhang path).
    for batch in (16, 10, 530):
        x = jax.random.normal(jax.random.fold_in(kx, batch),
                              (batch, input_dim), jnp.float32)
        out = jax.block_until_ready(fwd(x))

        # Pure-JAX reference of the PyTorch forward.
        ref = jnp.sin(x @ w1_t + b1) @ w2_t + b2
        ok &= out.shape == (batch, input_dim)
        ok &= bool(jnp.allclose(out, ref, atol=1e-5, rtol=1e-5))

    assert ok
    print("KERNEL_OK")
</pallas_src>

<mosaic_0001>
module attributes {stable_mosaic.version = 11 : i64} {
  func.func @interpolation_kernel(%arg0: i32, %arg1: memref<8x128xf32, #tpu.memory_space<vmem>>, %arg2: memref<128x64xf32, #tpu.memory_space<vmem>>, %arg3: memref<1x64xf32, #tpu.memory_space<vmem>>, %arg4: memref<64x128xf32, #tpu.memory_space<vmem>>, %arg5: memref<1x128xf32, #tpu.memory_space<vmem>>, %arg6: memref<8x128xf32, #tpu.memory_space<vmem>>) attributes {dimension_semantics = [#tpu.dimension_semantics<parallel>], iteration_bounds = array<i64: 1>, scalar_prefetch = 0 : i64, scratch_operands = 0 : i64, tpu.core_type = #tpu.core_type<tc>, window_params = [{transform_indices = @transform_0, window_bounds = array<i64: 8, 128>}, {pipeline_mode = #tpu.pipeline_mode<synchronous>, transform_indices = @transform_1, window_bounds = array<i64: 128, 64>}, {pipeline_mode = #tpu.pipeline_mode<synchronous>, transform_indices = @transform_2, window_bounds = array<i64: 1, 64>}, {pipeline_mode = #tpu.pipeline_mode<synchronous>, transform_indices = @transform_3, window_bounds = array<i64: 64, 128>}, {pipeline_mode = #tpu.pipeline_mode<synchronous>, transform_indices = @transform_4, window_bounds = array<i64: 1, 128>}, {transform_indices = @transform_5, window_bounds = array<i64: 8, 128>}]} {
    %c0 = arith.constant 0 : index
    %c0_0 = arith.constant 0 : index
    %0 = vector.load %arg1[%c0, %c0_0] : memref<8x128xf32, #tpu.memory_space<vmem>>, vector<8x128xf32>
    %c0_1 = arith.constant 0 : index
    %c0_2 = arith.constant 0 : index
    %1 = vector.load %arg2[%c0_1, %c0_2] : memref<128x64xf32, #tpu.memory_space<vmem>>, vector<128x64xf32>
    %cst = arith.constant dense<0.000000e+00> : vector<8x64xf32>
    %2 = tpu.matmul %0, %1, %cst {dimension_numbers = #tpu.dot_dimension_numbers<[1], [0], [0], [1], [0, 0, 1, 1], [], []>} : vector<8x128xf32>, vector<128x64xf32>, vector<8x64xf32> -> vector<8x64xf32>
    %c0_3 = arith.constant 0 : index
    %c0_4 = arith.constant 0 : index
    %3 = vector.load %arg3[%c0_3, %c0_4] : memref<1x64xf32, #tpu.memory_space<vmem>>, vector<1x64xf32>
    %4 = vector.broadcast %3 : vector<1x64xf32> to vector<8x64xf32>
    %5 = arith.addf %2, %4 : vector<8x64xf32>
    %6 = math.sin %5 : vector<8x64xf32>
    %c0_5 = arith.constant 0 : index
    %c0_6 = arith.constant 0 : index
    %7 = vector.load %arg4[%c0_5, %c0_6] : memref<64x128xf32, #tpu.memory_space<vmem>>, vector<64x128xf32>
    %cst_7 = arith.constant dense<0.000000e+00> : vector<8x128xf32>
    %8 = tpu.matmul %6, %7, %cst_7 {dimension_numbers = #tpu.dot_dimension_numbers<[1], [0], [0], [1], [0, 0, 1, 1], [], []>} : vector<8x64xf32>, vector<64x128xf32>, vector<8x128xf32> -> vector<8x128xf32>
    %c0_8 = arith.constant 0 : index
    %c0_9 = arith.constant 0 : index
    %9 = vector.load %arg5[%c0_8, %c0_9] : memref<1x128xf32, #tpu.memory_space<vmem>>, vector<1x128xf32>
    %10 = vector.broadcast %9 : vector<1x128xf32> to vector<8x128xf32>
    %11 = arith.addf %8, %10 : vector<8x128xf32>
    %c0_10 = arith.constant 0 : index
    %c0_11 = arith.constant 0 : index
    %12 = vector.load %arg6[%c0_10, %c0_11] : memref<8x128xf32, #tpu.memory_space<vmem>>, vector<8x128xf32>
    tpu.vector_store %arg6[%c0_10, %c0_11], %11 {strides = array<i32>} : memref<8x128xf32, #tpu.memory_space<vmem>>, vector<8x128xf32>,
    return
  }
  func.func @transform_0(%arg0: i32) -> (i32, i32) {
    %c0_i32 = arith.constant 0 : i32
    %c0_i32_0 = arith.constant 0 : i32
    return %arg0, %c0_i32 : i32, i32
  }
  func.func @transform_1(%arg0: i32) -> (i32, i32) {
    %c0_i32 = arith.constant 0 : i32
    %c0_i32_0 = arith.constant 0 : i32
    %c0_i32_1 = arith.constant 0 : i32
    return %c0_i32, %c0_i32_0 : i32, i32
  }
  func.func @transform_2(%arg0: i32) -> (i32, i32) {
    %c0_i32 = arith.constant 0 : i32
    %c0_i32_0 = arith.constant 0 : i32
    %c0_i32_1 = arith.constant 0 : i32
    return %c0_i32, %c0_i32_0 : i32, i32
  }
  func.func @transform_3(%arg0: i32) -> (i32, i32) {
    %c0_i32 = arith.constant 0 : i32
    %c0_i32_0 = arith.constant 0 : i32
    %c0_i32_1 = arith.constant 0 : i32
    return %c0_i32, %c0_i32_0 : i32, i32
  }
  func.func @transform_4(%arg0: i32) -> (i32, i32) {
    %c0_i32 = arith.constant 0 : i32
    %c0_i32_0 = arith.constant 0 : i32
    %c0_i32_1 = arith.constant 0 : i32
    return %c0_i32, %c0_i32_0 : i32, i32
  }
  func.func @transform_5(%arg0: i32) -> (i32, i32) {
    %c0_i32 = arith.constant 0 : i32
    %c0_i32_0 = arith.constant 0 : i32
    return %arg0, %c0_i32 : i32, i32
  }
}

</mosaic_0001>

<bundles_post_ra>
// kernel: _lambda_.1
= control target key start
LH: loop header
LB: loop body
LE: loop exit
PB: predicated region body
PF: predicated region fallthrough
CT: control target
= control target key end

     0   :  { %10 = vsyncpa [#allocation3], 0  ;;  %s637_s0 = inlined_call_operand.vmem [shape: f32[4,128], index: 0, kind: input, shape index: {}]   ;;  %s638_s1 = inlined_call_operand.hbm [shape: f32[128,64], index: 1, kind: input, shape index: {}]   ;;  %s639_s2 = inlined_call_operand.vmem [shape: f32[1,64], index: 2, kind: input, shape index: {}]   ;;  %s640_s3 = inlined_call_operand.hbm [shape: f32[64,128], index: 3, kind: input, shape index: {}]   ;;  %s641_s4 = inlined_call_operand.vmem [shape: f32[1,128], index: 4, kind: input, shape index: {}]   ;;  %s642_s5 = inlined_call_operand.vmem [shape: f32[4,128], index: 5, kind: output, shape index: {}]  }
   0x1   :  { %11 = vsyncpa [#allocation5], 0  ;;  %s530_s18 = smov [#allocation2]  }
   0x2   :  { %s19_s19 = sshll.u32 %s530_s18, 4  ;;  %s20_s19 = int_to_ptr.vmem [resolvable:$true] %s19_s19 }
   0x3   :  { %s494_s20 = scalar_lea.vmem %s20_s19, 2048  ;;  %p499_p1 = scmp.lt.s32.totalorder %s20_s19, %s20_s19 }
   0x4   :  { %p495_p0 = scmp.ne.s32.totalorder %s20_s19, %s494_s20  ;;  %p500_p2 = scmp.lt.s32.totalorder %s494_s20, %s494_s20 }
   0x6   :  { %p501_p3 = por %p500_p2, %p499_p1 }
   0x8   :  { %p502_p4 = pnand %p501_p3, %p495_p0 }
   0xa   :  { %505 = shalt.err (!%p502_p4)
}
   0xb   :  { %s531_s21 = smov 128   ;;  %s532_s22 = smov 8  }
   0xc   :  { %25 = dma.hbm_to_vmem [thread:$0]  %s638_s1, 2048, %s20_s19, [#allocation3], %s531_s21, %s531_s21, %s532_s22  }
   0xd   :  { %s533_s25 = smov [#allocation4]  }
   0xe   :  { %s33_s26 = sshll.u32 %s533_s25, 4  ;;  %s34_s26 = int_to_ptr.vmem [resolvable:$true] %s33_s26 }
   0xf   :  { %s514_s27 = scalar_lea.vmem %s34_s26, 1024  ;;  %p519_p6 = scmp.lt.s32.totalorder %s34_s26, %s34_s26 }
  0x10   :  { %p515_p5 = scmp.ne.s32.totalorder %s34_s26, %s514_s27  ;;  %p520_p7 = scmp.lt.s32.totalorder %s514_s27, %s514_s27 }
  0x12   :  { %p521_p8 = por %p520_p7, %p519_p6 }
  0x14   :  { %p522_p9 = pnand %p521_p8, %p515_p5 }
  0x16   :  { %525 = shalt.err (!%p522_p9)
}
  0x17   :  { %39 = dma.hbm_to_vmem [thread:$0]  %s640_s3, 1024, %s34_s26, [#allocation5], %s531_s21, %s531_s21, %s532_s22  }
  0x18   :  { %526 = dma.done.wait [#allocation3], 2048  }
  0x19   :  { %527 = vsyncadd [#allocation3], 4294965248 }
  0x1a   :  { %528 = dma.done.wait [#allocation5], 1024  }
  0x1b   :  { %529 = vsyncadd [#allocation5], 4294966272  ;;  %v534_v0 = vmov 0.0   ;;  %vm535_vm0 = vmmov 0   ;;  %v64_v1 = vld [vmem:[#allocation2 + $0x78] sm:$0xff]  ;;  %v63_v2 = vld [vmem:[#allocation2 + $0x70] sm:$0xff] }
  0x1c   :  { %412 = vmatprep.subr.mxu0 %v534_v0  ;;  %444 = vmatprep.mubr.msk.f32.mxu0 %vm535_vm0, %v534_v0  ;;  %v62_v3 = vld [vmem:[#allocation2 + $0x68] sm:$0xff]  ;;  %v61_v4 = vld [vmem:[#allocation2 + $0x60] sm:$0xff]  ;;  %v60_v5 = vld [vmem:[#allocation2 + $0x58] sm:$0xff]  ;;  %v536_v40 = vmov 683565275   ;;  %vm261_vm13 = vcmask 523264  }
  0x1d   :  { %447 = vmatprep.subr.mxu1 %v534_v0  ;;  %463 = vmatprep.mubr.msk.f32.mxu1 %vm535_vm0, %v534_v0  ;;  %v59_v6 = vld [vmem:[#allocation2 + $0x50] sm:$0xff]  ;;  %v58_v7 = vld [vmem:[#allocation2 + $0x48] sm:$0xff]  ;;  %v57_v8 = vld [vmem:[#allocation2 + $0x40] sm:$0xff]  ;;  %v537_v42 = vmov 2475754826  }
  0x1e   :  { %413 = vmatpush3.msra.mxu0 %v64_v1  ;;  %v56_v9 = vld [vmem:[#allocation2 + $0x38] sm:$0xff]  ;;  %v55_v10 = vld [vmem:[#allocation2 + $0x30] sm:$0xff]  ;;  %v54_v11 = vld [vmem:[#allocation2 + $0x28] sm:$0xff]  ;;  %v538_v45 = vmov 2131351028  }
  0x1f   :  { %414 = vmatprep.subr.mxu0 %v534_v0  ;;  %v53_v12 = vld [vmem:[#allocation2 + $0x20] sm:$0xff]  ;;  %v52_v13 = vld [vmem:[#allocation2 + $0x18] sm:$0xff]  ;;  %v51_v14 = vld [vmem:[#allocation2 + $0x10] sm:$0xff]  ;;  %v539_v48 = vmov 2102212464  }
  0x20   :  { %415 = vmatpush3.msra.mxu0 %v63_v2  ;;  %v50_v15 = vld [vmem:[#allocation2 + $0x8] sm:$0xff]  ;;  %v49_v16 = vld [vmem:[#allocation2] sm:$0xff]  ;;  %v253_v18 = vld [vmem:[#allocation4 + $0x38] sm:$0xff]  ;;  %v540_v51 = vmov 920167782  }
  0x21   :  { %416 = vmatprep.subr.mxu0 %v534_v0  ;;  %v48_v17 = vld [vmem:[%s637_s0] sm:$0xff]  ;;  %v252_v19 = vld [vmem:[#allocation4 + $0x30] sm:$0xff]  ;;  %448 = vmatpush3.msra.mxu1 %v253_v18  ;;  %v251_v20 = vld [vmem:[#allocation4 + $0x28] sm:$0xff]  ;;  %v541_v54 = vmov 1326507024  }
  0x22   :  { %417 = vmatpush3.msra.mxu0 %v62_v3  ;;  %449 = vmatprep.subr.mxu1 %v534_v0  ;;  %v250_v21 = vld [vmem:[#allocation4 + $0x20] sm:$0xff]  ;;  %v249_v22 = vld [vmem:[#allocation4 + $0x18] sm:$0xff]  ;;  %v248_v23 = vld [vmem:[#allocation4 + $0x10] sm:$0xff] }
  0x23   :  { %418 = vmatprep.subr.mxu0 %v534_v0  ;;  %450 = vmatpush3.msra.mxu1 %v252_v19  ;;  %v247_v24 = vld [vmem:[#allocation4 + $0x8] sm:$0xff]  ;;  %v246_v25 = vld [vmem:[#allocation4] sm:$0xff] }
  0x24   :  { %419 = vmatpush3.msra.mxu0 %v61_v4  ;;  %451 = vmatprep.subr.mxu1 %v534_v0  ;;  %v379_v26 = vld [vmem:[%s639_s2] ss:$0 sm:$0xff] }
  0x25   :  { %420 = vmatprep.subr.mxu0 %v534_v0  ;;  %452 = vmatpush3.msra.mxu1 %v251_v20 }
  0x26   :  { %421 = vmatpush3.msra.mxu0 %v60_v5  ;;  %453 = vmatprep.subr.mxu1 %v534_v0 }
  0x27   :  { %422 = vmatprep.subr.mxu0 %v534_v0  ;;  %454 = vmatpush3.msra.mxu1 %v250_v21 }
  0x28   :  { %423 = vmatpush3.msra.mxu0 %v59_v6  ;;  %455 = vmatprep.subr.mxu1 %v534_v0 }
  0x29   :  { %424 = vmatprep.subr.mxu0 %v534_v0  ;;  %456 = vmatpush3.msra.mxu1 %v249_v22 }
  0x2a   :  { %425 = vmatpush3.msra.mxu0 %v58_v7  ;;  %457 = vmatprep.subr.mxu1 %v534_v0 }
  0x2b   :  { %426 = vmatprep.subr.mxu0 %v534_v0  ;;  %458 = vmatpush3.msra.mxu1 %v248_v23 }
  0x2c   :  { %427 = vmatpush3.msra.mxu0 %v57_v8  ;;  %459 = vmatprep.subr.mxu1 %v534_v0 }
  0x2d   :  { %428 = vmatprep.subr.mxu0 %v534_v0  ;;  %460 = vmatpush3.msra.mxu1 %v247_v24 }
  0x2e   :  { %429 = vmatpush3.msra.mxu0 %v56_v9  ;;  %461 = vmatprep.subr.mxu1 %v534_v0 }
  0x2f   :  { %430 = vmatprep.subr.mxu0 %v534_v0  ;;  %462 = vmatpush3.msra.mxu1 %v246_v25 }
  0x30   :  { %431 = vmatpush3.msra.mxu0 %v55_v10 }
  0x31   :  { %432 = vmatprep.subr.mxu0 %v534_v0 }
  0x32   :  { %433 = vmatpush3.msra.mxu0 %v54_v11 }
  0x33   :  { %434 = vmatprep.subr.mxu0 %v534_v0 }
  0x34   :  { %435 = vmatpush3.msra.mxu0 %v53_v12 }
  0x35   :  { %436 = vmatprep.subr.mxu0 %v534_v0 }
  0x36   :  { %437 = vmatpush3.msra.mxu0 %v52_v13 }
  0x37   :  { %438 = vmatprep.subr.mxu0 %v534_v0 }
  0x38   :  { %439 = vmatpush3.msra.mxu0 %v51_v14 }
  0x39   :  { %440 = vmatprep.subr.mxu0 %v534_v0 }
  0x3a   :  { %441 = vmatpush3.msra.mxu0 %v50_v15 }
  0x3b   :  { %442 = vmatprep.subr.mxu0 %v534_v0 }
  0x3c   :  { %443 = vmatpush3.msra.mxu0 %v49_v16 }
  0x3d   :  { %445 = vmatmul.mubr.f32.vlgmr.msra.gmra.mxu0 %v48_v17 }
  0xfd   :  { %v138_v27 = vpop.f32.mrf.mxu0 }
  0xfe   :  { %v610_v28 = vadd.f32 %v379_v26, %v138_v27 }
  0xff   :  { %v446_v29 = vpop.f32.mrf.mxu0 }
 0x100   :  { %v145_v30 = vand.u32 2139095040, %v610_v28  ;;  %v142_v34 = vand.u32 2147483647, %v610_v28  ;;  %vm144_vm8 = vcmp.lt.s32.totalorder %v610_v28, 0  ;;  %vm234_vm14 = vweird.f32 %v610_v28 }
 0x102   :  { %v146_v31 = vshrl.u32 %v145_v30, 23  ;;  %v149_v37 = vand.u32 8388607, %v142_v34  ;;  %vm143_vm9 = vcmp.le.f32.partialorder %v142_v34, 0.7853982 }
 0x104   :  { %v380_v32 = vadd.s32 4294967169, %v146_v31  ;;  %v150_v56 = vor.u32 8388608, %v149_v37 }
 0x106   :  { %v152_v33 = vadd.s32 1, %v380_v32  ;;  %v190_v6 = vshll.u32 %v150_v56, 8 }
 0x108   :  { %vm153_vm1 = vcmp.gt.s32.totalorder %v152_v33, 0 }
 0x109   :  { %v154_v35 = vsel %vm153_vm1, %v152_v33, 0 }
 0x10a   :  { %v156_v36 = vand.u32 31, %v154_v35  ;;  %v155_v39 = vshrl.u32 %v154_v35, 5 }
 0x10c   :  { %v157_v38 = vsub.s32 32, %v156_v36  ;;  %v159_v41 = vshll.u32 %v536_v40, %v156_v36  ;;  %v162_v43 = vshll.u32 %v537_v42, %v156_v36  ;;  %v165_v47 = vshll.u32 %v538_v45, %v156_v36 }
 0x10d   :  { %v168_v50 = vshll.u32 %v539_v48, %v156_v36  ;;  %v171_v53 = vshll.u32 %v540_v51, %v156_v36  ;;  %vm174_vm2 = vcmp.lt.s32.totalorder %v155_v39, 1  ;;  %vm177_vm3 = vcmp.lt.s32.totalorder %v155_v39, 4 }
 0x10e   :  { %v160_v44 = vshrl.u32 %v537_v42, %v157_v38  ;;  %v163_v46 = vshrl.u32 %v538_v45, %v157_v38  ;;  %v166_v49 = vshrl.u32 %v539_v48, %v157_v38  ;;  %v169_v52 = vshrl.u32 %v540_v51, %v157_v38 }
 0x10f   :  { %v172_v55 = vshrl.u32 %v541_v54, %v157_v38  ;;  %v158_v1 = vshrl.u32 %v536_v40, %v157_v38  ;;  %vm176_vm4 = vcmp.lt.s32.totalorder %v155_v39, 3  ;;  %vm175_vm5 = vcmp.lt.s32.totalorder %v155_v39, 2 }
 0x110   :  { %v161_v57 = vor.u32 %v160_v44, %v159_v41  ;;  %v164_v58 = vor.u32 %v163_v46, %v162_v43  ;;  %v167_v59 = vor.u32 %v166_v49, %v165_v47  ;;  %v170_v60 = vor.u32 %v169_v52, %v168_v50 }
 0x111   :  { %v173_v61 = vor.u32 %v172_v55, %v171_v53 }
 0x112   :  { %v179_v62 = vsel %vm177_vm3, %v167_v59, 2102212464  ;;  %v182_v63 = vsel %vm174_vm2, %v161_v57, %v164_v58  ;;  %v186_v0 = vsel %vm174_vm2, %v164_v58, %v167_v59  ;;  %v183_v2 = vsel %vm177_vm3, %v170_v60, 920167782 }
 0x113   :  { %v187_v3 = vsel %vm177_vm3, %v173_v61, 1326507024  ;;  %v184_v4 = vsel %vm176_vm4, %v167_v59, %v183_v2  ;;  %v178_v7 = vsel %vm174_vm2, %v158_v1, %v161_v57  ;;  %v180_v8 = vsel %vm176_vm4, %v164_v58, %v179_v62  ;;  %v384_v58 = vld [vmem:[%s641_s4] ss:$0 sm:$0xff] }
 0x114   :  { %v188_v5 = vsel %vm176_vm4, %v170_v60, %v187_v3  ;;  %v185_v9 = vsel %vm175_vm5, %v182_v63, %v184_v4  ;;  %v181_v15 = vsel %vm175_vm5, %v178_v7, %v180_v8 }
 0x115   :  { %v189_v10 = vsel %vm175_vm5, %v186_v0, %v188_v5  ;;  %v619_v13 = vmul.u32.u64.low %v190_v6, %v185_v9  ;;  %v620_v14 = vmul.u32.u64.high %v190_v6, %v185_v9, %v619_v13  ;;  %v197_v17 = vmul.u32 %v190_v6, %v181_v15 }
 0x116   :  { %v616_v11 = vmul.u32.u64.low %v190_v6, %v189_v10  ;;  %v617_v12 = vmul.u32.u64.high %v190_v6, %v189_v10, %v616_v11 }
 0x117   :  { %v200_v16 = vadd.s32 1, %v620_v14 }
 0x118   :  { %vm199_vm6 = vc.u32 %v617_v12, %v619_v13  ;;  %v198_v30 = vadd.s32 %v619_v13, %v617_v12 }
 0x119   :  { %v201_v18 = vsel %vm199_vm6, %v200_v16, %v620_v14 }
 0x11a   :  { %v202_v19 = vadd.s32 %v201_v18, %v197_v17 }
 0x11c   :  { %v203_v20 = vadd.s32 536870912, %v202_v19 }
 0x11e   :  { %v204_v21 = vshrl.u32 %v203_v20, 30 }
 0x120   :  { %v205_v22 = vshll.u32 %v204_v21, 30  ;;  %v228_v44 = vsub.s32 4, %v204_v21 }
 0x122   :  { %v206_v23 = vsub.s32 %v202_v19, %v205_v22  ;;  %v229_v47 = vsel %vm144_vm8, %v228_v44, %v204_v21 }
 0x123   :  { %v231_v48 = vsel %vm143_vm9, 0, %v229_v47 }
 0x124   :  { %v208_v24 = vsub.s32 0, %v206_v23  ;;  %v235_v49 = vadd.s32 3, %v231_v48 }
 0x126   :  { %v381_v25 = vmin.u32 %v208_v24, %v206_v23  ;;  %v236_v50 = vand.u32 3, %v235_v49 }
 0x128   :  { %v210_v26 = vclz %v381_v25  ;;  %vm241_vm10 = vcmp.eq.s32.totalorder %v236_v50, 2  ;;  %vm238_vm11 = vcmp.eq.s32.totalorder %v236_v50, 0  ;;  %vm237_vm12 = vcmp.lt.s32.totalorder %v236_v50, 2 }
 0x12a   :  { %v382_v27 = vadd.s32 4294967294, %v210_v26 }
 0x12c   :  { %vm383_vm7 = vcmp.lt.s32.totalorder %v382_v27, 0 }
 0x12d   :  { %v213_v29 = vsel %vm383_vm7, 0, %v382_v27 }
 0x12e   :  { %v214_v31 = vsub.s32 32, %v213_v29  ;;  %v218_v32 = vsub.s32 4294967266, %v213_v29  ;;  %v215_v33 = vshll.u32 %v206_v23, %v213_v29 }
 0x130   :  { %v216_v35 = vshrl.u32 %v198_v30, %v214_v31  ;;  %v219_v36 = vadd.s32 127, %v218_v32 }
 0x132   :  { %v217_v37 = vor.u32 %v216_v35, %v215_v33  ;;  %v220_v38 = vshll.u32 %v219_v36, 23 }
 0x134   :  { %v221_v39 = vor.u32 4788187, %v220_v38  ;;  %v224_v41 = vcvt.s32.f32 %v217_v37 }
 0x136   :  { %v222_v40 = vand.u32 2147483647, %v221_v39 }
 0x138   :  { %v225_v42 = vmul.f32 %v224_v41, %v222_v40 }
 0x13a   :  { %v226_v43 = vxor.u32 2147483648, %v225_v42 }
 0x13c   :  { %v227_v45 = vsel %vm144_vm8, %v226_v43, %v225_v42 }
 0x13d   :  { %v230_v46 = vsel %vm143_vm9, %v610_v28, %v227_v45 }
 0x13e   :  { %482 = vcosq.f32 %v230_v46 }
 0x13f   :  { %484 = vsinq.f32 %v230_v46 }
 0x14b   :  { %v483_v51 = vpop.eup %482 }
 0x14c   :  { %v485_v52 = vpop.eup %484  ;;  %v242_v53 = vxor.u32 2147483648, %v483_v51 }
 0x14d   :  { %v239_v54 = vxor.u32 2147483648, %v485_v52 }
 0x14e   :  { %v243_v55 = vsel %vm241_vm10, %v242_v53, %v485_v52 }
 0x14f   :  { %v240_v56 = vsel %vm238_vm11, %v483_v51, %v239_v54 }
 0x150   :  { %v244_v34 = vsel %vm237_vm12, %v240_v56, %v243_v55 }
 0x151   :  { %v245_v57 = vsel %vm234_vm14, nan, %v244_v34 }
 0x152   :  { %464 = vmatmul.mubr.msk.f32.vlgmr.msra.gmra.mxu1 %vm261_vm13, %v245_v57 }
 0x212   :  { %v331_v59 = vpop.f32.mrf.mxu1 }
 0x213   :  { %v332_v60 = vadd.f32 %v384_v58, %v331_v59 }
 0x214   :  { %v465_v61 = vpop.f32.mrf.mxu1 }
 0x215   :  { %335 = vst [vmem:[#allocation6] sm:$0xff] %v332_v60 }
 0x21c   :  { %v354_v62 = vld [vmem:[#allocation6] sm:$0xf] }
 0x21d   :  { %355 = vst [vmem:[%s642_s5] sm:$0xf] %v354_v62 }
 0x21e   :  { %373 = vsyncpa [#allocation3], 1 }
 0x21f   :  { %374 = vsyncpa [#allocation5], 1 }

</bundles_post_ra>
